<compile_context>
chip_gen: v5e
topology: v5e:2x2
jax: 0.10.0
libtpu: 0.0.40
codegen_flags: <defaults>
</compile_context>

<pallas_src>
import functools
import math

import jax
import jax.numpy as jnp
from jax import lax
from jax.experimental import pallas as pl
from jax.experimental.pallas import tpu as pltpu


def _round_up(v, m):
    return ((v + m - 1) // m) * m


def _sublane_granule(dtype):
    itemsize = jnp.dtype(dtype).itemsize
    return {4: 8, 2: 16, 1: 32}.get(itemsize, 8)


def _vmem_capacity_bytes():
    """Physical VMEM per TensorCore; conservative fallback (v7x size)."""
    try:
        return int(pltpu.get_tpu_info().vmem_capacity_bytes)
    except Exception:
        return 64 << 20


# ----------------------------------------------------------------------------
# Kernels
# ----------------------------------------------------------------------------


def _maybe_cast(x, w, compute_dtype):
    if compute_dtype is not None:
        return x.astype(compute_dtype), w.astype(compute_dtype)
    return x, w


def _linear_kernel_single(x_ref, w_ref, b_ref, o_ref, *, compute_dtype):
    # Whole problem in one VMEM block: no grid/pipeline machinery.
    x, w = _maybe_cast(x_ref[...], w_ref[...], compute_dtype)
    acc = jnp.dot(x, w, preferred_element_type=jnp.float32)
    o_ref[...] = (acc + b_ref[...].astype(jnp.float32)).astype(o_ref.dtype)


def _accumulate(x_ref, w_ref, acc_like_ref, *, k_rem, compute_dtype):
    """Add this K-step's contribution into acc_like_ref (o_ref or scratch)."""
    k = pl.program_id(2)
    nk = pl.num_programs(2)

    def contrib(x, w):
        x, w = _maybe_cast(x, w, compute_dtype)
        return jnp.dot(x, w, preferred_element_type=jnp.float32)

    if k_rem == 0:
        acc_like_ref[...] += contrib(x_ref[...], w_ref[...]).astype(
            acc_like_ref.dtype
        )
    else:
        # Ragged K tail: mask both operand tiles only on the last K step, so
        # no HBM-side padding of x or W is ever needed.
        @pl.when(k < nk - 1)
        def _():
            acc_like_ref[...] += contrib(x_ref[...], w_ref[...]).astype(
                acc_like_ref.dtype
            )

        @pl.when(k == nk - 1)
        def _():
            x = x_ref[...]
            w = w_ref[...]
            xmask = lax.broadcasted_iota(jnp.int32, x.shape, 1) < k_rem
            wmask = lax.broadcasted_iota(jnp.int32, w.shape, 0) < k_rem
            x = jnp.where(xmask, x, jnp.zeros_like(x))
            w = jnp.where(wmask, w, jnp.zeros_like(w))
            acc_like_ref[...] += contrib(x, w).astype(acc_like_ref.dtype)


def _linear_kernel_direct(x_ref, w_ref, b_ref, o_ref, *, k_rem, compute_dtype):
    """f32 output: accumulate straight into the resident output block."""
    @pl.when(pl.program_id(2) == 0)
    def _():
        o_ref[...] = jnp.broadcast_to(
            b_ref[...].astype(o_ref.dtype), o_ref.shape
        )

    _accumulate(x_ref, w_ref, o_ref, k_rem=k_rem, compute_dtype=compute_dtype)


def _linear_kernel_acc(x_ref, w_ref, b_ref, o_ref, acc_ref, *, k_rem,
                       compute_dtype):
    """Low-precision output: f32 VMEM accumulator, cast once at the end."""
    @pl.when(pl.program_id(2) == 0)
    def _():
        acc_ref[...] = jnp.broadcast_to(
            b_ref[...].astype(jnp.float32), acc_ref.shape
        )

    _accumulate(x_ref, w_ref, acc_ref, k_rem=k_rem, compute_dtype=compute_dtype)

    @pl.when(pl.program_id(2) == pl.num_programs(2) - 1)
    def _():
        o_ref[...] = acc_ref[...].astype(o_ref.dtype)


# ----------------------------------------------------------------------------
# Wrapper
# ----------------------------------------------------------------------------


def _linear_2d(x2, weight, bias, compute_dtype=None):
    """y = x2 @ weight + bias for 2-D x2 via a tiled Pallas matmul."""
    M, K = x2.shape
    Kw, N = weight.shape
    assert Kw == K, f"in_channels mismatch: {Kw} vs {K}"
    out_dtype = x2.dtype

    # ---- generation-aware tile budget ------------------------------------
    vmem_cap = _vmem_capacity_bytes()
    if vmem_cap >= (100 << 20):        # v5e / v6e: 128 MiB VMEM per TC
        tk_cap, vmem_limit = 2048, 48 << 20
    else:                              # v7x: 64 MiB VMEM per TC
        tk_cap, vmem_limit = 1024, 32 << 20

    sub = _sublane_granule(x2.dtype)
    tm = min(_round_up(M, sub), 512)
    tn = min(_round_up(N, 128), 512)   # lane-dense output tiles
    tk = min(_round_up(K, 128), tk_cap)

    # v7x has 2 TensorCores: if M collapses to one tile, split N so the
    # parallel grid still has >=2 blocks (near-neutral on v5e/v6e).
    if pl.cdiv(M, tm) == 1 and _round_up(N, 128) > 128:
        tn = min(tn, _round_up((N + 1) // 2, 128))

    grid = (pl.cdiv(M, tm), pl.cdiv(N, tn), pl.cdiv(K, tk))
    b2 = bias.reshape(1, N)

    # ---- tiny-problem fast path: one block, no grid, no masking ----------
    if grid == (1, 1, 1):
        kernel = functools.partial(
            _linear_kernel_single, compute_dtype=compute_dtype)
        return pl.pallas_call(
            kernel,
            out_shape=jax.ShapeDtypeStruct((M, N), out_dtype),
            compiler_params=pltpu.CompilerParams(
                vmem_limit_bytes=vmem_limit),
        )(x2, weight, b2)

    # ---- tiled path -------------------------------------------------------
    k_rem = K % tk  # static; 0 means no ragged K tail to mask

    if jnp.dtype(out_dtype) == jnp.dtype(jnp.float32):
        kernel = functools.partial(
            _linear_kernel_direct, k_rem=k_rem, compute_dtype=compute_dtype)
        scratch_shapes = []
    else:
        kernel = functools.partial(
            _linear_kernel_acc, k_rem=k_rem, compute_dtype=compute_dtype)
        scratch_shapes = [pltpu.VMEM((tm, tn), jnp.float32)]

    itemsize = jnp.dtype(out_dtype).itemsize
    cost = pl.CostEstimate(
        flops=2 * M * N * K + M * N,
        transcendentals=0,
        bytes_accessed=(M * K + K * N + M * N + N) * itemsize,
    )

    return pl.pallas_call(
        kernel,
        out_shape=jax.ShapeDtypeStruct((M, N), out_dtype),
        grid=grid,
        in_specs=[
            pl.BlockSpec((tm, tk), lambda i, j, k: (i, k)),
            pl.BlockSpec((tk, tn), lambda i, j, k: (k, j)),
            pl.BlockSpec((1, tn), lambda i, j, k: (0, j)),
        ],
        out_specs=pl.BlockSpec((tm, tn), lambda i, j, k: (i, j)),
        scratch_shapes=scratch_shapes,
        compiler_params=pltpu.CompilerParams(
            dimension_semantics=("parallel", "parallel", "arbitrary"),
            vmem_limit_bytes=vmem_limit,
        ),
        cost_estimate=cost,
    )(x2, weight, b2)


def linear_pallas(x, weight, bias, compute_dtype=None):
    """y = x @ weight + bias using a tiled Pallas TPU matmul kernel.

    x: (..., in_channels) -- a 3-D input with a singleton dim 1 is squeezed
    weight: (in_channels, out_channels)
    bias: (out_channels,)
    compute_dtype: optional (e.g. jnp.bfloat16) opt-in MXU compute dtype;
                   accumulation stays f32.
    """
    # Mirror the PyTorch forward's squeeze(dim=1) behavior for 3-D inputs.
    if x.ndim == 3 and x.shape[1] == 1:
        x = jnp.squeeze(x, axis=1)

    lead_shape = x.shape[:-1]
    K = x.shape[-1]
    M = int(math.prod(lead_shape)) if lead_shape else 1
    x2 = x.reshape(M, K)

    N = weight.shape[1]
    out = _linear_2d(x2, weight, bias, compute_dtype=compute_dtype)
    return out.reshape(*lead_shape, N) if lead_shape else out.reshape(N)


def init_linear_params(key, in_channels, out_channels, dtype=jnp.float32):
    # Mirrors Linear.reset_parameters: uniform(-stdv, stdv), stdv = 1/sqrt(in)
    stdv = 1.0 / math.sqrt(in_channels)
    kw, kb = jax.random.split(key)
    weight = jax.random.uniform(
        kw, (in_channels, out_channels), dtype=dtype, minval=-stdv, maxval=stdv
    )
    bias = jax.random.uniform(
        kb, (out_channels,), dtype=dtype, minval=-stdv, maxval=stdv
    )
    return weight, bias


if __name__ == "__main__":
    key = jax.random.PRNGKey(0)
    k_params, k_x = jax.random.split(key)

    batch = 8
    in_channels = 32
    out_channels = 64

    weight, bias = init_linear_params(k_params, in_channels, out_channels)

    # 3-D input with a singleton dim 1, as the forward explicitly handles.
    x = jax.random.normal(k_x, (batch, 1, in_channels), dtype=jnp.float32)

    y = jax.block_until_ready(linear_pallas(x, weight, bias))

    x_sq = jnp.squeeze(x, axis=1)
    y_ref = x_sq @ weight + bias
    assert y.shape == (batch, out_channels), y.shape
    assert jnp.allclose(y, y_ref, atol=1e-5, rtol=1e-5), "mismatch vs reference"

    # Secondary check exercising the tiled grid path: multi-block M/N/K with
    # ragged M/N tails (partial-block write-back) and a ragged K tail
    # (in-kernel masking), with no wrapper-side padding.
    M2, K2, N2 = 600, 2500, 520
    kx2, kw2, kb2 = jax.random.split(jax.random.PRNGKey(1), 3)
    x_big = jax.random.normal(kx2, (M2, K2), dtype=jnp.float32)
    w_big = jax.random.normal(kw2, (K2, N2), dtype=jnp.float32) * 0.05
    b_big = jax.random.normal(kb2, (N2,), dtype=jnp.float32)
    y_big = jax.block_until_ready(linear_pallas(x_big, w_big, b_big))
    y_big_ref = (
        jnp.dot(x_big, w_big, precision=jax.lax.Precision.HIGHEST) + b_big
    )
    assert y_big.shape == (M2, N2), y_big.shape
    assert jnp.allclose(y_big, y_big_ref, atol=5e-3, rtol=5e-3), "mismatch (tiled)"

    print("KERNEL_OK")
</pallas_src>

<mosaic_0001>
module attributes {stable_mosaic.version = 11 : i64} {
  func.func @_linear_kernel_single(%arg0: memref<8x32xf32, #tpu.memory_space<vmem>>, %arg1: memref<32x64xf32, #tpu.memory_space<vmem>>, %arg2: memref<1x64xf32, #tpu.memory_space<vmem>>, %arg3: memref<8x64xf32, #tpu.memory_space<vmem>>) attributes {dimension_semantics = [], scalar_prefetch = 0 : i64, scratch_operands = 0 : i64, tpu.core_type = #tpu.core_type<tc>} {
    %c0 = arith.constant 0 : index
    %c0_0 = arith.constant 0 : index
    %0 = vector.load %arg0[%c0, %c0_0] : memref<8x32xf32, #tpu.memory_space<vmem>>, vector<8x32xf32>
    %c0_1 = arith.constant 0 : index
    %c0_2 = arith.constant 0 : index
    %1 = vector.load %arg1[%c0_1, %c0_2] : memref<32x64xf32, #tpu.memory_space<vmem>>, vector<32x64xf32>
    %cst = arith.constant dense<0.000000e+00> : vector<8x64xf32>
    %2 = tpu.matmul %0, %1, %cst {dimension_numbers = #tpu.dot_dimension_numbers<[1], [0], [0], [1], [0, 0, 1, 1], [], []>} : vector<8x32xf32>, vector<32x64xf32>, vector<8x64xf32> -> vector<8x64xf32>
    %c0_3 = arith.constant 0 : index
    %c0_4 = arith.constant 0 : index
    %3 = vector.load %arg2[%c0_3, %c0_4] : memref<1x64xf32, #tpu.memory_space<vmem>>, vector<1x64xf32>
    %4 = vector.broadcast %3 : vector<1x64xf32> to vector<8x64xf32>
    %5 = arith.addf %2, %4 : vector<8x64xf32>
    %c0_5 = arith.constant 0 : index
    %c0_6 = arith.constant 0 : index
    %6 = vector.load %arg3[%c0_5, %c0_6] : memref<8x64xf32, #tpu.memory_space<vmem>>, vector<8x64xf32>
    tpu.vector_store %arg3[%c0_5, %c0_6], %5 {strides = array<i32>} : memref<8x64xf32, #tpu.memory_space<vmem>>, vector<8x64xf32>,
    return
  }
}

</mosaic_0001>

<bundles_post_ra>
// kernel: tpu_custom_call.1
= control target key start
LH: loop header
LB: loop body
LE: loop exit
PB: predicated region body
PF: predicated region fallthrough
CT: control target
= control target key end

     0   :  { %8 = vsyncpa [#allocation3], 0  ;;  %s220_s0 = inlined_call_operand.hbm [shape: f32[8,32], index: 0, kind: input, shape index: {}]   ;;  %s221_s1 = inlined_call_operand.hbm [shape: f32[32,64], index: 1, kind: input, shape index: {}]   ;;  %s222_s2 = inlined_call_operand.vmem [shape: f32[1,64], index: 2, kind: input, shape index: {}]   ;;  %s223_s3 = inlined_call_operand.hbm [shape: f32[8,64], index: 3, kind: output, shape index: {}]  }
   0x1   :  { %9 = vsyncpa [#allocation6], 0 }
   0x2   :  { %10 = vsyncpa [#allocation4], 0  ;;  %s16_s14 = sshll.u32 %s220_s0, 4  ;;  %s183_s15 = smov [#allocation2]   ;;  %s17_s14 = int_to_ptr.hbm [resolvable:$true] %s16_s14 }
   0x3   :  { %s18_s16 = sshll.u32 %s183_s15, 4  ;;  %s26_s19 = sshll.u32 %s221_s1, 4  ;;  %s19_s16 = int_to_ptr.vmem [resolvable:$true] %s18_s16  ;;  %s27_s19 = int_to_ptr.hbm [resolvable:$true] %s26_s19 }
   0x4   :  { %21 = dma.hbm_to_vmem [thread:$0]  %s17_s14, 128, %s19_s16, [#allocation3]  }
   0x5   :  { %s184_s20 = smov [#allocation5]   ;;  %s185_s22 = smov 128  }
   0x6   :  { %s28_s21 = sshll.u32 %s184_s20, 4  ;;  %s186_s23 = smov 8   ;;  %s29_s21 = int_to_ptr.vmem [resolvable:$true] %s28_s21 }
   0x7   :  { %34 = dma.hbm_to_vmem [thread:$0]  %s27_s19, 512, %s29_s21, [#allocation6], %s185_s22, %s185_s22, %s186_s23  }
   0x8   :  { %177 = dma.done.wait [#allocation3], 128  }
   0x9   :  { %178 = vsyncadd [#allocation3], 4294967168 }
   0xa   :  { %179 = dma.done.wait [#allocation6], 512  }
   0xb   :  { %180 = vsyncadd [#allocation6], 4294966784  ;;  %v49_v0 = vld [vmem:[#allocation5 + $0x18] sm:$0xff]  ;;  %v48_v1 = vld [vmem:[#allocation5 + $0x10] sm:$0xff]  ;;  %vm54_vm0 = vcmask 261120   ;;  %s187_s24 = smov [#allocation7]  }
   0xc   :  { %70 = vmatpush.msra.mxu0 %v49_v0  ;;  %v47_v2 = vld [vmem:[#allocation5 + $0x8] sm:$0xff]  ;;  %v46_v3 = vld [vmem:[#allocation5] sm:$0xff]  ;;  %v45_v4 = vld [vmem:[#allocation2] sm:$0xff]  ;;  %s85_s25 = sshll.u32 %s187_s24, 4  ;;  %s87_s28 = sshll.u32 %s223_s3, 4  ;;  %vm78_vm1 = vcmask 523264   ;;  %s86_s25 = int_to_ptr.vmem [resolvable:$true] %s85_s25  ;;  %s88_s28 = int_to_ptr.hbm [resolvable:$true] %s87_s28 }
   0xd   :  { %v104_v5 = vld [vmem:[%s222_s2] ss:$0 sm:$0xff] }
   0xe   :  { %71 = vmatpush.msra.mxu0 %v48_v1 }
  0x10   :  { %72 = vmatpush.msra.mxu0 %v47_v2 }
  0x12   :  { %73 = vmatpush.msra.mxu0 %v46_v3 }
  0x13   :  { %98 = vmatmul.msk.f32.vlgmr.msra.gmra.mxu0 %vm54_vm0, %v45_v4 }
  0x90   :  { %v75_v6 = vpop.f32.mrf.mxu0 }
  0x91   :  { %v76_v7 = vadd.f32 %v104_v5, %v75_v6 }
  0x93   :  { %79 = vst.msk [vmem:[#allocation7] sm:$0xff] %vm78_vm1, %v76_v7 }
  0x94   :  { %90 = dma.vmem_to_hbm [thread:$0]  %s86_s25, 128, %s88_s28, [#allocation4]  }
  0x95   :  { %181 = dma.done.wait [#allocation4], 128  }
  0x96   :  { %182 = vsyncadd [#allocation4], 4294967168 }
  0x97   :  { %95 = vsyncpa [#allocation3], 1 }
  0x98   :  { %96 = vsyncpa [#allocation6], 1 }
  0x99   :  { %97 = vsyncpa [#allocation4], 1 }

</bundles_post_ra>
